<compile_context>
chip_gen: v7x
topology: tpu7x:2x2x1
jax: 0.10.0
libtpu: 0.0.40
codegen_flags: <defaults>
</compile_context>

<pallas_src>
import functools

import jax
import jax.numpy as jnp
from jax.experimental import pallas as pl
from jax.experimental.pallas import tpu as pltpu


def _mlp_kernel(x_ref, w1_ref, b1_ref, w2_ref, b2_ref, o_ref):
    # fc1 on the MXU, f32 accumulation regardless of streaming dtype.
    h = jnp.dot(x_ref[...], w1_ref[...], preferred_element_type=jnp.float32)
    # bias + ReLU in f32 on the VPU (v5e VPU has no bf16).
    h = jnp.maximum(h + b1_ref[...], 0.0)
    # fc2 on the MXU; cast h to the weight streaming dtype (no-op for f32).
    out = jnp.dot(h.astype(w2_ref.dtype), w2_ref[...],
                  preferred_element_type=jnp.float32)
    # Narrow (tile_n, num_class) store — masked vst, but the store slot has
    # plenty of slack; this minimizes the dominant writeback DMA bytes.
    o_ref[...] = (out + b2_ref[...]).astype(o_ref.dtype)


def prepare_params(w1, b1, w2, b2, *, compute_dtype=jnp.float32):
    """One-time layout prep (call at init, NOT per forward):
       - transpose PyTorch-layout weights to (in_features, out_features)
       - reshape biases to (1, out); biases stay f32 (added post-accumulation)
       - optionally cast weights to bf16 for MXU-native streaming."""
    dim_hid, dim_in = w1.shape
    num_class = w2.shape[0]
    w1_t = jnp.asarray(w1, jnp.float32).T.astype(compute_dtype)   # (dim_in, dim_hid)
    b1_2d = jnp.asarray(b1, jnp.float32).reshape(1, dim_hid)
    w2_t = jnp.asarray(w2, jnp.float32).T.astype(compute_dtype)   # (dim_hid, num_class)
    b2_2d = jnp.asarray(b2, jnp.float32).reshape(1, num_class)
    return w1_t, b1_2d, w2_t, b2_2d


def _round_up(x, m):
    return ((x + m - 1) // m) * m


def _select_tile_n(n, preferred=1024):
    # Keep >= 4 grid steps (>= 2 per TensorCore on v7x, and enough steps for
    # double-buffering on single-TC chips); rows in multiples of 256 sublanes.
    t = min(preferred, _round_up(pl.cdiv(n, 4), 256))
    return max(t, 8)


@functools.partial(jax.jit, static_argnames=("tile_n",))
def node_classification_forward(x, params, *, tile_n=None):
    """x: (N, dim_in).  params: output of prepare_params().  Returns (N, num_class) f32."""
    w1_t, b1_2d, w2_t, b2_2d = params
    n, dim_in = x.shape
    dim_hid = w1_t.shape[1]
    num_class = w2_t.shape[1]

    if tile_n is None:
        tile_n = _select_tile_n(n)
    grid = (pl.cdiv(n, tile_n),)

    param_bytes = sum(int(p.size) * p.dtype.itemsize
                      for p in (w1_t, b1_2d, w2_t, b2_2d))
    cost = pl.CostEstimate(
        flops=2 * n * (dim_in * dim_hid + dim_hid * num_class),
        transcendentals=0,
        bytes_accessed=n * dim_in * x.dtype.itemsize    # streamed x
        + n * num_class * 4                             # streamed output (f32)
        + param_bytes,                                  # resident params
    )

    out = pl.pallas_call(
        _mlp_kernel,
        out_shape=jax.ShapeDtypeStruct((n, num_class), jnp.float32),
        grid_spec=pltpu.PrefetchScalarGridSpec(
            num_scalar_prefetch=0,
            grid=grid,
            in_specs=[
                # streamed per row-tile (double-buffered by the pipeline);
                # ragged final block handled by Pallas (no wrapper padding).
                pl.BlockSpec((tile_n, dim_in), lambda i: (i, 0)),
                # VMEM-resident parameters (constant block index, full extents)
                pl.BlockSpec((dim_in, dim_hid), lambda i: (0, 0)),
                pl.BlockSpec((1, dim_hid), lambda i: (0, 0)),
                pl.BlockSpec((dim_hid, num_class), lambda i: (0, 0)),
                pl.BlockSpec((1, num_class), lambda i: (0, 0)),
            ],
            out_specs=pl.BlockSpec((tile_n, num_class), lambda i: (i, 0)),
        ),
        compiler_params=pltpu.CompilerParams(
            # Pure row-parallel work, no reduction axis -> shardable across
            # TensorCores (v7x megacore); harmless on single-TC v5e/v6e.
            dimension_semantics=("parallel",),
        ),
        cost_estimate=cost,
    )(x, w1_t, b1_2d, w2_t, b2_2d)

    return out


if __name__ == "__main__":
    # Small but tiling-exercising shapes: N not a multiple of the tile,
    # several grid steps, num_class far below a lane row.
    N, DIM_IN, DIM_HID, NUM_CLASS = 1000, 32, 64, 8

    key = jax.random.PRNGKey(0)
    kx, kw1, kb1, kw2, kb2 = jax.random.split(key, 5)

    x = jax.random.normal(kx, (N, DIM_IN), dtype=jnp.float32)

    # Deterministic parameter init (uniform, a la PyTorch Linear default bounds).
    bound1 = 1.0 / (DIM_IN ** 0.5)
    w1 = jax.random.uniform(kw1, (DIM_HID, DIM_IN), jnp.float32, -bound1, bound1)
    b1 = jax.random.uniform(kb1, (DIM_HID,), jnp.float32, -bound1, bound1)
    bound2 = 1.0 / (DIM_HID ** 0.5)
    w2 = jax.random.uniform(kw2, (NUM_CLASS, DIM_HID), jnp.float32, -bound2, bound2)
    b2 = jax.random.uniform(kb2, (NUM_CLASS,), jnp.float32, -bound2, bound2)

    # Pure-JAX reference (PyTorch nn.Linear semantics).
    ref = jnp.maximum(x @ w1.T + b1, 0.0) @ w2.T + b2

    # --- f32 path: exact parity with the reference -------------------------
    params_f32 = prepare_params(w1, b1, w2, b2)
    out = jax.block_until_ready(node_classification_forward(x, params_f32))
    assert out.shape == (N, NUM_CLASS)
    assert jnp.allclose(out, ref, atol=1e-5, rtol=1e-5)

    # --- bf16 streaming path (halves the dominant x read; f32 accumulation) -
    params_bf16 = prepare_params(w1, b1, w2, b2, compute_dtype=jnp.bfloat16)
    out_bf16 = jax.block_until_ready(
        node_classification_forward(x.astype(jnp.bfloat16), params_bf16))
    assert out_bf16.shape == (N, NUM_CLASS)
    assert jnp.allclose(out_bf16, ref, atol=1e-1, rtol=5e-2)

    print("KERNEL_OK")
</pallas_src>

<mosaic_0001>
module attributes {stable_mosaic.version = 11 : i64} {
  func.func @_mlp_kernel(%arg0: i32, %arg1: memref<256x32xf32, #tpu.memory_space<vmem>>, %arg2: memref<32x64xf32, #tpu.memory_space<vmem>>, %arg3: memref<1x64xf32, #tpu.memory_space<vmem>>, %arg4: memref<64x8xf32, #tpu.memory_space<vmem>>, %arg5: memref<1x8xf32, #tpu.memory_space<vmem>>, %arg6: memref<256x8xf32, #tpu.memory_space<vmem>>) attributes {dimension_semantics = [#tpu.dimension_semantics<parallel>], iteration_bounds = array<i64: 4>, scalar_prefetch = 0 : i64, scratch_operands = 0 : i64, tpu.core_type = #tpu.core_type<tc>, window_params = [{transform_indices = @transform_0, window_bounds = array<i64: 256, 32>}, {pipeline_mode = #tpu.pipeline_mode<synchronous>, transform_indices = @transform_1, window_bounds = array<i64: 32, 64>}, {pipeline_mode = #tpu.pipeline_mode<synchronous>, transform_indices = @transform_2, window_bounds = array<i64: 1, 64>}, {pipeline_mode = #tpu.pipeline_mode<synchronous>, transform_indices = @transform_3, window_bounds = array<i64: 64, 8>}, {pipeline_mode = #tpu.pipeline_mode<synchronous>, transform_indices = @transform_4, window_bounds = array<i64: 1, 8>}, {transform_indices = @transform_5, window_bounds = array<i64: 256, 8>}]} {
    %c0 = arith.constant 0 : index
    %c0_0 = arith.constant 0 : index
    %0 = vector.load %arg1[%c0, %c0_0] : memref<256x32xf32, #tpu.memory_space<vmem>>, vector<256x32xf32>
    %c0_1 = arith.constant 0 : index
    %c0_2 = arith.constant 0 : index
    %1 = vector.load %arg2[%c0_1, %c0_2] : memref<32x64xf32, #tpu.memory_space<vmem>>, vector<32x64xf32>
    %cst = arith.constant dense<0.000000e+00> : vector<256x64xf32>
    %2 = tpu.matmul %0, %1, %cst {dimension_numbers = #tpu.dot_dimension_numbers<[1], [0], [0], [1], [0, 0, 1, 1], [], []>} : vector<256x32xf32>, vector<32x64xf32>, vector<256x64xf32> -> vector<256x64xf32>
    %c0_3 = arith.constant 0 : index
    %c0_4 = arith.constant 0 : index
    %3 = vector.load %arg3[%c0_3, %c0_4] : memref<1x64xf32, #tpu.memory_space<vmem>>, vector<1x64xf32>
    %4 = vector.broadcast %3 : vector<1x64xf32> to vector<256x64xf32>
    %5 = arith.addf %2, %4 : vector<256x64xf32>
    %cst_5 = arith.constant 0.000000e+00 : f32
    %6 = vector.broadcast %cst_5 : f32 to vector<256x64xf32>
    %7 = arith.maximumf %5, %6 : vector<256x64xf32>
    %c0_6 = arith.constant 0 : index
    %c0_7 = arith.constant 0 : index
    %8 = vector.load %arg4[%c0_6, %c0_7] : memref<64x8xf32, #tpu.memory_space<vmem>>, vector<64x8xf32>
    %cst_8 = arith.constant dense<0.000000e+00> : vector<256x8xf32>
    %9 = tpu.matmul %7, %8, %cst_8 {dimension_numbers = #tpu.dot_dimension_numbers<[1], [0], [0], [1], [0, 0, 1, 1], [], []>} : vector<256x64xf32>, vector<64x8xf32>, vector<256x8xf32> -> vector<256x8xf32>
    %c0_9 = arith.constant 0 : index
    %c0_10 = arith.constant 0 : index
    %10 = vector.load %arg5[%c0_9, %c0_10] : memref<1x8xf32, #tpu.memory_space<vmem>>, vector<1x8xf32>
    %11 = vector.broadcast %10 : vector<1x8xf32> to vector<256x8xf32>
    %12 = arith.addf %9, %11 : vector<256x8xf32>
    %c0_11 = arith.constant 0 : index
    %c0_12 = arith.constant 0 : index
    %13 = vector.load %arg6[%c0_11, %c0_12] : memref<256x8xf32, #tpu.memory_space<vmem>>, vector<256x8xf32>
    tpu.vector_store %arg6[%c0_11, %c0_12], %12 {strides = array<i32>} : memref<256x8xf32, #tpu.memory_space<vmem>>, vector<256x8xf32>,
    return
  }
  func.func @transform_0(%arg0: i32) -> (i32, i32) {
    %c0_i32 = arith.constant 0 : i32
    %c0_i32_0 = arith.constant 0 : i32
    return %arg0, %c0_i32 : i32, i32
  }
  func.func @transform_1(%arg0: i32) -> (i32, i32) {
    %c0_i32 = arith.constant 0 : i32
    %c0_i32_0 = arith.constant 0 : i32
    %c0_i32_1 = arith.constant 0 : i32
    return %c0_i32, %c0_i32_0 : i32, i32
  }
  func.func @transform_2(%arg0: i32) -> (i32, i32) {
    %c0_i32 = arith.constant 0 : i32
    %c0_i32_0 = arith.constant 0 : i32
    %c0_i32_1 = arith.constant 0 : i32
    return %c0_i32, %c0_i32_0 : i32, i32
  }
  func.func @transform_3(%arg0: i32) -> (i32, i32) {
    %c0_i32 = arith.constant 0 : i32
    %c0_i32_0 = arith.constant 0 : i32
    %c0_i32_1 = arith.constant 0 : i32
    return %c0_i32, %c0_i32_0 : i32, i32
  }
  func.func @transform_4(%arg0: i32) -> (i32, i32) {
    %c0_i32 = arith.constant 0 : i32
    %c0_i32_0 = arith.constant 0 : i32
    %c0_i32_1 = arith.constant 0 : i32
    return %c0_i32, %c0_i32_0 : i32, i32
  }
  func.func @transform_5(%arg0: i32) -> (i32, i32) {
    %c0_i32 = arith.constant 0 : i32
    %c0_i32_0 = arith.constant 0 : i32
    return %arg0, %c0_i32 : i32, i32
  }
}

</mosaic_0001>

<bundles_post_ra>
// kernel: node_classification_forward.1
= control target key start
LH: loop header
LB: loop body
LE: loop exit
PB: predicated region body
PF: predicated region fallthrough
CT: control target
= control target key end

     0   :  { %s1879_s18 = smov 0   ;;  %s1881_s19 = smov 0   ;;  %s2330_s0 = inlined_call_operand.vmem [shape: f32[1000,32], index: 0, kind: input, shape index: {}]   ;;  %s2331_s1 = inlined_call_operand.vmem [shape: f32[32,64], index: 1, kind: input, shape index: {}]   ;;  %s2332_s2 = inlined_call_operand.vmem [shape: f32[1,64], index: 2, kind: input, shape index: {}]   ;;  %s2333_s3 = inlined_call_operand.vmem [shape: f32[64,8], index: 3, kind: input, shape index: {}]   ;;  %s2334_s4 = inlined_call_operand.vmem [shape: f32[1,8], index: 4, kind: input, shape index: {}]   ;;  %s2335_s5 = inlined_call_operand.vmem [shape: f32[1000,8], index: 5, kind: output, shape index: {}]  }
   0x1   :  { %s1883_s20 = smov 0  }
   0x2 LB: > { %s1892_s21 = sadd.s32 4294967295, %s1815_s20   ;;  %s1894_s22 = sadd.s32 1, %s1815_s20   ;;  %s1815_s20 = sphi %s1883_s20, %s2344_s20   ;;  %s1811_s19 = sphi %s1881_s19, %s2343_s19   ;;  %s1807_s18 = sphi %s1879_s18, %s2342_s18  }
   0x3   : > { %s129_s23 = ssub.s32 %s1815_s20, %s1894_s22  ;;  %s132_s24 = sadd.s32 1, %s1811_s19 }
   0x4   : > { %p130_p0 = scmp.eq.s32.totalorder %s129_s23, 0  ;;  %p142_p1 = scmp.ne.s32.totalorder %s1811_s19, %s1807_s18 }
   0x5   : > { %p143_p2 = scmp.eq.s32.totalorder %s1892_s21, 3  ;;  %p1355_p3 = scmp.ge.s32.totalorder %s1815_s20, 1 }
   0x6   : > { %s1902_s25 = scalar_select %p130_p0, %s1811_s19, %s132_s24  }
   0x7   : > { %p1904_p4 = por %p143_p2, %p142_p1  ;;  %p196_p5 = scmp.lt.s32.totalorder %s1815_s20, 5 }
   0x9   : > { %p197_p6 = pnand %p1355_p3, %p196_p5 }
   0xa   : > { %v278_v0 = vld [vmem:[%s2331_s1] sm:$0xff] (!%p197_p6)  ;;  %v279_v1 = vld [vmem:[%s2331_s1 + $0x8] sm:$0xff] (!%p197_p6)  ;;  %v280_v2 = vld [vmem:[%s2331_s1 + $0x10] sm:$0xff] (!%p197_p6)  ;;  %s1918_s8 = sshll.u32 (!%p197_p6), %s1892_s21, 5  ;;  %vm289_vm0 = vcmask (!%p197_p6), 261120   ;;  %vm658_vm1 = vcmask (!%p197_p6), 523264  }
   0xb   : > { %200 = sbr.rel (%p197_p6) target bundleno = 574 (0x23e), region = 40  ;;  %v1641_v3 = vpack.c.bf16 (!%p197_p6), %v279_v1, %v278_v0  ;;  %v281_v4 = vld [vmem:[%s2331_s1 + $0x18] sm:$0xff] (!%p197_p6)  ;;  %p232_p7 = scmp.lt.s32.totalorder (!%p197_p6), %s1918_s8, 124  ;;  %v643_v5 = vld [vmem:[%s2333_s3] sm:$0xff] (!%p197_p6)  ;;  %v644_v6 = vld [vmem:[%s2333_s3 + $0x8] sm:$0xff] (!%p197_p6)  ;;  %vm980_vm2 = vcmask (!%p197_p6), 64512  }
   0xc   : > { %v1645_v7 = vpack.c.bf16 (!%p197_p6), %v281_v4, %v280_v2  ;;  %v1649_v8 = vpack.c.bf16 (!%p197_p6), %v644_v6, %v643_v5  ;;  %v645_v9 = vld [vmem:[%s2333_s3 + $0x10] sm:$0xff] (!%p197_p6)  ;;  %v646_v10 = vld [vmem:[%s2333_s3 + $0x18] sm:$0xff] (!%p197_p6)  ;;  %v647_v12 = vld [vmem:[%s2333_s3 + $0x20] sm:$0xff] (!%p197_p6)  ;;  %s224_s16 = sand.u32 (!%p197_p6), 1, %s1807_s18  }
   0xd   : > { %1642 = vmatprep.subr.bf16.mxu0 (!%p197_p6), %v1641_v3  ;;  %v1653_v11 = vpack.c.bf16 (!%p197_p6), %v646_v10, %v645_v9  ;;  %v648_v13 = vld [vmem:[%s2333_s3 + $0x28] sm:$0xff] (!%p197_p6)  ;;  %v649_v47 = vld [vmem:[%s2333_s3 + $0x30] sm:$0xff] (!%p197_p6)  ;;  %v650_v48 = vld [vmem:[%s2333_s3 + $0x38] sm:$0xff] (!%p197_p6)  ;;  %s1356_s17 = sshll.u32 (!%p197_p6), %s224_s16, 8 }
   0xe   : > { %1644 = vmatpush3.bf16.msra.mxu0 (!%p197_p6), %v1641_v3  ;;  %1665 = vmatprep.subr.bf16.mxu1 (!%p197_p6), %v1649_v8  ;;  %v1657_v16 = vpack.c.bf16 (!%p197_p6), %v648_v13, %v647_v12  ;;  %v1661_v49 = vpack.c.bf16 (!%p197_p6), %v650_v48, %v649_v47  ;;  %v2021_v50 = vld [vmem:[%s2332_s2] ss:$0 sm:$0xff] (!%p197_p6) }
   0xf   : > { %1646 = vmatprep.subr.bf16.mxu0 (!%p197_p6), %v1645_v7  ;;  %1669 = vmatpush3.bf16.msra.mxu1 (!%p197_p6), %v1649_v8 }
  0x10   : > { %1666 = vmatprep.subr.bf16.mxu1 (!%p197_p6), %v1653_v11 }
  0x12   : > { %s233_s23 = scalar_select %p232_p7, %s1918_s8, 124  ;;  %1648 = vmatpush3.bf16.msra.mxu0 %v1645_v7 }
  0x13   : > { %1650 = vmatprep.subr.bf16.mxu0 %v1649_v8  ;;  %1670 = vmatpush3.bf16.msra.mxu1 %v1653_v11  ;;  %s1021_s18 = ssub.s32 (%p1904_p4), 125, %s1918_s8  ;;  %s1442_s27 = sshll.u32 (%p1904_p4), %s1892_s21, 8 }
  0x14   : > { %s1358_s24 = sshll.u32 %s233_s23, 3  ;;  %1667 = vmatprep.subr.bf16.mxu1 %v1657_v16  ;;  %p1022_p8 = scmp.lt.s32.totalorder (%p1904_p4), %s1021_s18, 32 }
  0x15   : > { %s1946_s9 = scalar_lea.vmem %s2330_s0, %s1358_s24  ;;  %s2095_s24 = scalar_lea.vmem [#allocation2], %s1356_s17  }
  0x16   : > { %v246_v14 = vld [vmem:[%s1946_s9] sm:$0xff]  ;;  %v247_v15 = vld [vmem:[%s1946_s9 + $0x8] sm:$0xff]  ;;  %v248_v17 = vld [vmem:[%s1946_s9 + $0x10] sm:$0xff]  ;;  %s2198_s30 = scalar_lea.vmem (%p1904_p4), %s2335_s5, %s1442_s27  }
  0x17   : > { %1529 = vmatprep.mubr.msk.f32.mxu0 %vm289_vm0, %v246_v14  ;;  %v249_v18 = vld [vmem:[%s1946_s9 + $0x18] sm:$0xff]  ;;  %v250_v19 = vld [vmem:[%s1946_s9 + $0x20] sm:$0xff]  ;;  %1671 = vmatpush3.bf16.msra.mxu1 %v1657_v16  ;;  %v251_v20 = vld [vmem:[%s1946_s9 + $0x28] sm:$0xff] }
  0x18   : > { %1530 = vmatmul.mubr.msk.f32.vlgmr.msra.gmra.mrb[0].mxu0 %vm289_vm0, %v247_v15  ;;  %v252_v21 = vld [vmem:[%s1946_s9 + $0x30] sm:$0xff]  ;;  %v253_v22 = vld [vmem:[%s1946_s9 + $0x38] sm:$0xff]  ;;  %v254_v23 = vld [vmem:[%s1946_s9 + $0x40] sm:$0xff]  ;;  %1668 = vmatprep.subr.bf16.mxu1 %v1661_v49 }
  0x19   : > { %1532 = vmatprep.mubr.msk.f32.mxu0 %vm289_vm0, %v248_v17  ;;  %1652 = vmatpush3.bf16.msra.mxu0 %v1649_v8  ;;  %v255_v24 = vld [vmem:[%s1946_s9 + $0x48] sm:$0xff]  ;;  %v256_v25 = vld [vmem:[%s1946_s9 + $0x50] sm:$0xff]  ;;  %v257_v26 = vld [vmem:[%s1946_s9 + $0x58] sm:$0xff] }
  0x1a   : > { %1654 = vmatprep.subr.bf16.mxu0 %v1653_v11  ;;  %v258_v27 = vld [vmem:[%s1946_s9 + $0x60] sm:$0xff]  ;;  %v259_v28 = vld [vmem:[%s1946_s9 + $0x68] sm:$0xff]  ;;  %v260_v29 = vld [vmem:[%s1946_s9 + $0x70] sm:$0xff] }
  0x1b   : > { %v261_v30 = vld [vmem:[%s1946_s9 + $0x78] sm:$0xff]  ;;  %v262_v31 = vld [vmem:[%s1946_s9 + $0x80] sm:$0xff]  ;;  %v263_v32 = vld [vmem:[%s1946_s9 + $0x88] sm:$0xff]  ;;  %1672 = vmatpush3.bf16.msra.mxu1 %v1661_v49 }
  0x1c   : > { %1533 = vmatmul.mubr.msk.f32.gmra.mrb[2].mxu0 %vm289_vm0, %v249_v18  ;;  %v264_v33 = vld [vmem:[%s1946_s9 + $0x90] sm:$0xff]  ;;  %v265_v34 = vld [vmem:[%s1946_s9 + $0x98] sm:$0xff]  ;;  %v266_v35 = vld [vmem:[%s1946_s9 + $0xa0] sm:$0xff] }
  0x1d   : > { %1535 = vmatprep.mubr.msk.f32.mxu0 %vm289_vm0, %v250_v19  ;;  %1656 = vmatpush3.bf16.msra.mxu0 %v1653_v11  ;;  %v267_v36 = vld [vmem:[%s1946_s9 + $0xa8] sm:$0xff]  ;;  %v268_v37 = vld [vmem:[%s1946_s9 + $0xb0] sm:$0xff]  ;;  %v269_v38 = vld [vmem:[%s1946_s9 + $0xb8] sm:$0xff] }
  0x1e   : > { %1658 = vmatprep.subr.bf16.mxu0 %v1657_v16  ;;  %v270_v39 = vld [vmem:[%s1946_s9 + $0xc0] sm:$0xff]  ;;  %v271_v40 = vld [vmem:[%s1946_s9 + $0xc8] sm:$0xff]  ;;  %v272_v41 = vld [vmem:[%s1946_s9 + $0xd0] sm:$0xff] }
  0x1f   : > { %v273_v42 = vld [vmem:[%s1946_s9 + $0xd8] sm:$0xff]  ;;  %v274_v43 = vld [vmem:[%s1946_s9 + $0xe0] sm:$0xff]  ;;  %v275_v44 = vld [vmem:[%s1946_s9 + $0xe8] sm:$0xff] }
  0x20   : > { %1536 = vmatmul.mubr.msk.f32.gmra.mrb[4].mxu0 %vm289_vm0, %v251_v20  ;;  %v276_v45 = vld [vmem:[%s1946_s9 + $0xf0] sm:$0xff]  ;;  %v277_v46 = vld [vmem:[%s1946_s9 + $0xf8] sm:$0xff] }
  0x21   : > { %1538 = vmatprep.mubr.msk.f32.mxu0 %vm289_vm0, %v252_v21  ;;  %1660 = vmatpush3.bf16.msra.mxu0 %v1657_v16 }
  0x22   : > { %1662 = vmatprep.subr.bf16.mxu0 %v1661_v49 }
  0x24   : > { %1539 = vmatmul.mubr.msk.f32.gmra.mrb[6].mxu0 %vm289_vm0, %v253_v22 }
  0x25   : > { %1541 = vmatprep.mubr.msk.f32.mxu0 %vm289_vm0, %v254_v23  ;;  %1664 = vmatpush3.bf16.msra.mxu0 %v1661_v49 }
  0x28   : > { %1542 = vmatmul.mubr.msk.f32.gmra.mrb[8].mxu0 %vm289_vm0, %v255_v24 }
  0x29   : > { %1544 = vmatprep.mubr.msk.f32.mxu0 %vm289_vm0, %v256_v25 }
  0x2c   : > { %1545 = vmatmul.mubr.msk.f32.gmra.mrb[10].mxu0 %vm289_vm0, %v257_v26 }
  0x2d   : > { %1547 = vmatprep.mubr.msk.f32.mxu0 %vm289_vm0, %v258_v27 }
  0x30   : > { %1548 = vmatmul.mubr.msk.f32.gmra.mrb[12].mxu0 %vm289_vm0, %v259_v28 }
  0x31   : > { %1550 = vmatprep.mubr.msk.f32.mxu0 %vm289_vm0, %v260_v29 }
  0x34   : > { %1551 = vmatmul.mubr.msk.f32.gmra.mrb[14].mxu0 %vm289_vm0, %v261_v30 }
  0x35   : > { %1553 = vmatprep.mubr.msk.f32.mxu0 %vm289_vm0, %v262_v31 }
  0x38   : > { %1554 = vmatmul.mubr.msk.f32.gmra.mrb[16].mxu0 %vm289_vm0, %v263_v32 }
  0x39   : > { %1556 = vmatprep.mubr.msk.f32.mxu0 %vm289_vm0, %v264_v33 }
  0x3c   : > { %1557 = vmatmul.mubr.msk.f32.gmra.mrb[18].mxu0 %vm289_vm0, %v265_v34 }
  0x3d   : > { %1559 = vmatprep.mubr.msk.f32.mxu0 %vm289_vm0, %v266_v35 }
  0x40   : > { %1560 = vmatmul.mubr.msk.f32.gmra.mrb[20].mxu0 %vm289_vm0, %v267_v36 }
  0x41   : > { %1562 = vmatprep.mubr.msk.f32.mxu0 %vm289_vm0, %v268_v37 }
  0x44   : > { %1563 = vmatmul.mubr.msk.f32.gmra.mrb[22].mxu0 %vm289_vm0, %v269_v38 }
  0x45   : > { %1565 = vmatprep.mubr.msk.f32.mxu0 %vm289_vm0, %v270_v39 }
  0x48   : > { %1566 = vmatmul.mubr.msk.f32.gmra.mrb[24].mxu0 %vm289_vm0, %v271_v40 }
  0x49   : > { %1568 = vmatprep.mubr.msk.f32.mxu0 %vm289_vm0, %v272_v41 }
  0x4c   : > { %1569 = vmatmul.mubr.msk.f32.gmra.mrb[26].mxu0 %vm289_vm0, %v273_v42 }
  0x4d   : > { %1571 = vmatprep.mubr.msk.f32.mxu0 %vm289_vm0, %v274_v43 }
  0x50   : > { %1572 = vmatmul.mubr.msk.f32.gmra.mrb[28].mxu0 %vm289_vm0, %v275_v44 }
  0x51   : > { %1574 = vmatprep.mubr.msk.f32.mxu0 %vm289_vm0, %v276_v45 }
  0x54   : > { %1575 = vmatmul.mubr.msk.f32.gmra.mrb[30].mxu0 %vm289_vm0, %v277_v46 }
  0xeb   : > { %v1531_v51 = vpop.f32.mrb[0].mxu0 }
  0xec   : > { %v458_v52 = vadd.f32 %v1531_v51, %v2021_v50  ;;  %v452_v53 = vpop.f32.mrb[1].mxu0 }
  0xed   : > { %v453_v54 = vadd.f32 %v2021_v50, %v452_v53 }
  0xee   : > { %v612_v57 = vmax.f32 %v458_v52, 0.0 }
  0xef   : > { %v611_v55 = vmax.f32 %v453_v54, 0.0  ;;  %v1534_v56 = vpop.f32.mrb[2].mxu0 }
  0xf0   : > { %v468_v58 = vadd.f32 %v1534_v56, %v2021_v50  ;;  %v462_v59 = vpop.f32.mrb[3].mxu0 }
  0xf1   : > { %v463_v60 = vadd.f32 %v2021_v50, %v462_v59  ;;  %1593 = vmatprep.mubr.msk.f32.mxu0 %vm658_vm1, %v611_v55 }
  0xf2   : > { %1594 = vmatmul.mubr.msk.f32.vlgmr.msra.gmra.mrb[32].mxu0 %vm658_vm1, %v612_v57  ;;  %v614_v63 = vmax.f32 %v468_v58, 0.0 }
  0xf3   : > { %v613_v61 = vmax.f32 %v463_v60, 0.0  ;;  %v1537_v62 = vpop.f32.mrb[4].mxu0 }
  0xf4   : > { %v478_v0 = vadd.f32 %v1537_v62, %v2021_v50  ;;  %v472_v1 = vpop.f32.mrb[5].mxu0 }
  0xf5   : > { %v473_v2 = vadd.f32 %v2021_v50, %v472_v1  ;;  %1596 = vmatprep.mubr.msk.f32.mxu1 %vm658_vm1, %v613_v61 }
  0xf6   : > { %1597 = vmatmul.mubr.msk.f32.vlgmr.msra.gmra.mrb[0].mxu1 %vm658_vm1, %v614_v63  ;;  %v616_v5 = vmax.f32 %v478_v0, 0.0 }
  0xf7   : > { %v615_v3 = vmax.f32 %v473_v2, 0.0  ;;  %v1540_v4 = vpop.f32.mrb[6].mxu0 }
  0xf8   : > { %v488_v6 = vadd.f32 %v1540_v4, %v2021_v50  ;;  %v482_v7 = vpop.f32.mrb[7].mxu0 }
  0xf9   : > { %v483_v8 = vadd.f32 %v2021_v50, %v482_v7  ;;  %1599 = vmatprep.mubr.msk.f32.mxu1 %vm658_vm1, %v615_v3 }
  0xfa   : > { %1600 = vmatmul.mubr.msk.f32.gmra.mrb[2].mxu1 %vm658_vm1, %v616_v5  ;;  %v618_v11 = vmax.f32 %v488_v6, 0.0 }
  0xfb   : > { %v617_v9 = vmax.f32 %v483_v8, 0.0  ;;  %v1543_v10 = vpop.f32.mrb[8].mxu0 }
  0xfc   : > { %v498_v12 = vadd.f32 %v1543_v10, %v2021_v50  ;;  %v492_v13 = vpop.f32.mrb[9].mxu0 }
  0xfd   : > { %v493_v14 = vadd.f32 %v2021_v50, %v492_v13  ;;  %1602 = vmatprep.mubr.msk.f32.mxu1 %vm658_vm1, %v617_v9 }
  0xfe   : > { %1603 = vmatmul.mubr.msk.f32.gmra.mrb[4].mxu1 %vm658_vm1, %v618_v11  ;;  %v620_v17 = vmax.f32 %v498_v12, 0.0 }
  0xff   : > { %v619_v15 = vmax.f32 %v493_v14, 0.0  ;;  %v1546_v16 = vpop.f32.mrb[10].mxu0 }
 0x100   : > { %v508_v18 = vadd.f32 %v1546_v16, %v2021_v50  ;;  %v502_v19 = vpop.f32.mrb[11].mxu0 }
 0x101   : > { %v503_v20 = vadd.f32 %v2021_v50, %v502_v19  ;;  %1605 = vmatprep.mubr.msk.f32.mxu1 %vm658_vm1, %v619_v15 }
 0x102   : > { %1606 = vmatmul.mubr.msk.f32.gmra.mrb[6].mxu1 %vm658_vm1, %v620_v17  ;;  %v622_v23 = vmax.f32 %v508_v18, 0.0 }
 0x103   : > { %v621_v21 = vmax.f32 %v503_v20, 0.0  ;;  %v1549_v22 = vpop.f32.mrb[12].mxu0  ;;  %v2091_v20 = vld [vmem:[%s2334_s4] ss:$0 sm:$0xff] }
 0x104   : > { %v518_v24 = vadd.f32 %v1549_v22, %v2021_v50  ;;  %v512_v25 = vpop.f32.mrb[13].mxu0 }
 0x105   : > { %v513_v26 = vadd.f32 %v2021_v50, %v512_v25  ;;  %1608 = vmatprep.mubr.msk.f32.mxu1 %vm658_vm1, %v621_v21 }
 0x106   : > { %1609 = vmatmul.mubr.msk.f32.gmra.mrb[8].mxu1 %vm658_vm1, %v622_v23  ;;  %v624_v29 = vmax.f32 %v518_v24, 0.0 }
 0x107   : > { %v623_v27 = vmax.f32 %v513_v26, 0.0  ;;  %v1552_v28 = vpop.f32.mrb[14].mxu0 }
 0x108   : > { %v528_v30 = vadd.f32 %v1552_v28, %v2021_v50  ;;  %v522_v31 = vpop.f32.mrb[15].mxu0 }
 0x109   : > { %v523_v32 = vadd.f32 %v2021_v50, %v522_v31  ;;  %1611 = vmatprep.mubr.msk.f32.mxu1 %vm658_vm1, %v623_v27 }
 0x10a   : > { %1612 = vmatmul.mubr.msk.f32.gmra.mrb[10].mxu1 %vm658_vm1, %v624_v29  ;;  %v626_v35 = vmax.f32 %v528_v30, 0.0 }
 0x10b   : > { %v625_v33 = vmax.f32 %v523_v32, 0.0  ;;  %v1555_v34 = vpop.f32.mrb[16].mxu0 }
 0x10c   : > { %v538_v36 = vadd.f32 %v1555_v34, %v2021_v50  ;;  %v532_v37 = vpop.f32.mrb[17].mxu0 }
 0x10d   : > { %v533_v38 = vadd.f32 %v2021_v50, %v532_v37  ;;  %1614 = vmatprep.mubr.msk.f32.mxu1 %vm658_vm1, %v625_v33 }
 0x10e   : > { %1615 = vmatmul.mubr.msk.f32.gmra.mrb[12].mxu1 %vm658_vm1, %v626_v35  ;;  %v628_v41 = vmax.f32 %v538_v36, 0.0 }
 0x10f   : > { %v627_v39 = vmax.f32 %v533_v38, 0.0  ;;  %v1558_v40 = vpop.f32.mrb[18].mxu0 }
 0x110   : > { %v548_v42 = vadd.f32 %v1558_v40, %v2021_v50  ;;  %v542_v43 = vpop.f32.mrb[19].mxu0 }
 0x111   : > { %v543_v44 = vadd.f32 %v2021_v50, %v542_v43  ;;  %1617 = vmatprep.mubr.msk.f32.mxu1 %vm658_vm1, %v627_v39 }
 0x112   : > { %1618 = vmatmul.mubr.msk.f32.gmra.mrb[14].mxu1 %vm658_vm1, %v628_v41  ;;  %v630_v47 = vmax.f32 %v548_v42, 0.0 }
 0x113   : > { %v629_v45 = vmax.f32 %v543_v44, 0.0  ;;  %v1561_v46 = vpop.f32.mrb[20].mxu0 }
 0x114   : > { %v558_v48 = vadd.f32 %v1561_v46, %v2021_v50  ;;  %v552_v49 = vpop.f32.mrb[21].mxu0 }
 0x115   : > { %v553_v51 = vadd.f32 %v2021_v50, %v552_v49  ;;  %1620 = vmatprep.mubr.msk.f32.mxu1 %vm658_vm1, %v629_v45 }
 0x116   : > { %1621 = vmatmul.mubr.msk.f32.gmra.mrb[16].mxu1 %vm658_vm1, %v630_v47  ;;  %v632_v54 = vmax.f32 %v558_v48, 0.0 }
 0x117   : > { %v631_v52 = vmax.f32 %v553_v51, 0.0  ;;  %v1564_v53 = vpop.f32.mrb[22].mxu0 }
 0x118   : > { %v568_v55 = vadd.f32 %v1564_v53, %v2021_v50  ;;  %v562_v56 = vpop.f32.mrb[23].mxu0 }
 0x119   : > { %v563_v57 = vadd.f32 %v2021_v50, %v562_v56  ;;  %1623 = vmatprep.mubr.msk.f32.mxu1 %vm658_vm1, %v631_v52 }
 0x11a   : > { %1624 = vmatmul.mubr.msk.f32.gmra.mrb[18].mxu1 %vm658_vm1, %v632_v54  ;;  %v634_v60 = vmax.f32 %v568_v55, 0.0 }
 0x11b   : > { %v633_v58 = vmax.f32 %v563_v57, 0.0  ;;  %v1567_v59 = vpop.f32.mrb[24].mxu0 }
 0x11c   : > { %v578_v61 = vadd.f32 %v1567_v59, %v2021_v50  ;;  %v572_v62 = vpop.f32.mrb[25].mxu0 }
 0x11d   : > { %v573_v63 = vadd.f32 %v2021_v50, %v572_v62  ;;  %1626 = vmatprep.mubr.msk.f32.mxu1 %vm658_vm1, %v633_v58 }
 0x11e   : > { %1627 = vmatmul.mubr.msk.f32.gmra.mrb[20].mxu1 %vm658_vm1, %v634_v60  ;;  %v636_v2 = vmax.f32 %v578_v61, 0.0 }
 0x11f   : > { %v635_v0 = vmax.f32 %v573_v63, 0.0  ;;  %v1570_v1 = vpop.f32.mrb[26].mxu0 }
 0x120   : > { %v588_v3 = vadd.f32 %v1570_v1, %v2021_v50  ;;  %v582_v4 = vpop.f32.mrb[27].mxu0 }
 0x121   : > { %v583_v5 = vadd.f32 %v2021_v50, %v582_v4  ;;  %1629 = vmatprep.mubr.msk.f32.mxu1 %vm658_vm1, %v635_v0 }
 0x122   : > { %1630 = vmatmul.mubr.msk.f32.gmra.mrb[22].mxu1 %vm658_vm1, %v636_v2  ;;  %v638_v8 = vmax.f32 %v588_v3, 0.0 }
 0x123   : > { %v637_v6 = vmax.f32 %v583_v5, 0.0  ;;  %v1573_v7 = vpop.f32.mrb[28].mxu0 }
 0x124   : > { %v598_v9 = vadd.f32 %v1573_v7, %v2021_v50  ;;  %v592_v10 = vpop.f32.mrb[29].mxu0 }
 0x125   : > { %v593_v11 = vadd.f32 %v2021_v50, %v592_v10  ;;  %1632 = vmatprep.mubr.msk.f32.mxu1 %vm658_vm1, %v637_v6 }
 0x126   : > { %1633 = vmatmul.mubr.msk.f32.gmra.mrb[24].mxu1 %vm658_vm1, %v638_v8  ;;  %v640_v14 = vmax.f32 %v598_v9, 0.0 }
 0x127   : > { %v639_v12 = vmax.f32 %v593_v11, 0.0  ;;  %v1576_v13 = vpop.f32.mrb[30].mxu0 }
 0x128   : > { %v608_v15 = vadd.f32 %v1576_v13, %v2021_v50  ;;  %v602_v16 = vpop.f32.mrb[31].mxu0 }
 0x129   : > { %v603_v17 = vadd.f32 %v2021_v50, %v602_v16  ;;  %1635 = vmatprep.mubr.msk.f32.mxu1 %vm658_vm1, %v639_v12 }
 0x12a   : > { %1636 = vmatmul.mubr.msk.f32.gmra.mrb[26].mxu1 %vm658_vm1, %v640_v14  ;;  %v642_v19 = vmax.f32 %v608_v15, 0.0 }
 0x12b   : > { %v641_v18 = vmax.f32 %v603_v17, 0.0 }
 0x12d   : > { %1638 = vmatprep.mubr.msk.f32.mxu1 %vm658_vm1, %v641_v18 }
 0x12e   : > { %1639 = vmatmul.mubr.msk.f32.gmra.mrb[28].mxu1 %vm658_vm1, %v642_v19 }
 0x1c5   : > { %v1595_v21 = vpop.f32.mrb[32].mxu0 }
 0x1c6   : > { %v827_v50 = vadd.f32 %v1595_v21, %v2091_v20  ;;  %v821_v22 = vpop.f32.mrb[33].mxu0 }
 0x1c7   : > { %v822_v23 = vadd.f32 %v2091_v20, %v821_v22 }
 0x1c8   : > { %982 = vst.msk [vmem:[%s2095_s24 + $0x8] sm:$0xff] %vm980_vm2, %v827_v50 }
 0x1c9   : > { %981 = vst.msk [vmem:[%s2095_s24] sm:$0xff] %vm980_vm2, %v822_v23  ;;  %v1598_v24 = vpop.f32.mrb[0].mxu1 }
 0x1ca   : > { %v837_v25 = vadd.f32 %v1598_v24, %v2091_v20  ;;  %v831_v26 = vpop.f32.mrb[1].mxu1 }
 0x1cb   : > { %v832_v27 = vadd.f32 %v2091_v20, %v831_v26 }
 0x1cc   : > { %984 = vst.msk [vmem:[%s2095_s24 + $0x18] sm:$0xff] %vm980_vm2, %v837_v25 }
 0x1cd   : > { %983 = vst.msk [vmem:[%s2095_s24 + $0x10] sm:$0xff] %vm980_vm2, %v832_v27  ;;  %v1601_v28 = vpop.f32.mrb[2].mxu1 }
 0x1ce   : > { %v847_v29 = vadd.f32 %v1601_v28, %v2091_v20  ;;  %v841_v30 = vpop.f32.mrb[3].mxu1 }
 0x1cf   : > { %v842_v31 = vadd.f32 %v2091_v20, %v841_v30 }
 0x1d0   : > { %986 = vst.msk [vmem:[%s2095_s24 + $0x28] sm:$0xff] %vm980_vm2, %v847_v29 }
 0x1d1   : > { %985 = vst.msk [vmem:[%s2095_s24 + $0x20] sm:$0xff] %vm980_vm2, %v842_v31  ;;  %v1604_v32 = vpop.f32.mrb[4].mxu1 }
 0x1d2   : > { %v857_v33 = vadd.f32 %v1604_v32, %v2091_v20  ;;  %v851_v34 = vpop.f32.mrb[5].mxu1 }
 0x1d3   : > { %v852_v35 = vadd.f32 %v2091_v20, %v851_v34 }
 0x1d4   : > { %988 = vst.msk [vmem:[%s2095_s24 + $0x38] sm:$0xff] %vm980_vm2, %v857_v33 }
 0x1d5   : > { %987 = vst.msk [vmem:[%s2095_s24 + $0x30] sm:$0xff] %vm980_vm2, %v852_v35  ;;  %v1607_v36 = vpop.f32.mrb[6].mxu1 }
 0x1d6   : > { %v867_v37 = vadd.f32 %v1607_v36, %v2091_v20  ;;  %v861_v38 = vpop.f32.mrb[7].mxu1 }
 0x1d7   : > { %v862_v39 = vadd.f32 %v2091_v20, %v861_v38 }
 0x1d8   : > { %990 = vst.msk [vmem:[%s2095_s24 + $0x48] sm:$0xff] %vm980_vm2, %v867_v37 }
 0x1d9   : > { %989 = vst.msk [vmem:[%s2095_s24 + $0x40] sm:$0xff] %vm980_vm2, %v862_v39  ;;  %v1610_v40 = vpop.f32.mrb[8].mxu1 }
 0x1da   : > { %v877_v41 = vadd.f32 %v1610_v40, %v2091_v20  ;;  %v871_v42 = vpop.f32.mrb[9].mxu1 }
 0x1db   : > { %v872_v43 = vadd.f32 %v2091_v20, %v871_v42 }
 0x1dc   : > { %992 = vst.msk [vmem:[%s2095_s24 + $0x58] sm:$0xff] %vm980_vm2, %v877_v41 }
 0x1dd   : > { %991 = vst.msk [vmem:[%s2095_s24 + $0x50] sm:$0xff] %vm980_vm2, %v872_v43  ;;  %v1613_v44 = vpop.f32.mrb[10].mxu1 }
 0x1de   : > { %v887_v45 = vadd.f32 %v1613_v44, %v2091_v20  ;;  %v881_v46 = vpop.f32.mrb[11].mxu1 }
 0x1df   : > { %v882_v47 = vadd.f32 %v2091_v20, %v881_v46 }
 0x1e0   : > { %994 = vst.msk [vmem:[%s2095_s24 + $0x68] sm:$0xff] %vm980_vm2, %v887_v45 }
 0x1e1   : > { %993 = vst.msk [vmem:[%s2095_s24 + $0x60] sm:$0xff] %vm980_vm2, %v882_v47  ;;  %v1616_v48 = vpop.f32.mrb[12].mxu1 }
 0x1e2   : > { %v897_v49 = vadd.f32 %v1616_v48, %v2091_v20  ;;  %v891_v51 = vpop.f32.mrb[13].mxu1 }
 0x1e3   : > { %v892_v52 = vadd.f32 %v2091_v20, %v891_v51 }
 0x1e4   : > { %996 = vst.msk [vmem:[%s2095_s24 + $0x78] sm:$0xff] %vm980_vm2, %v897_v49 }
 0x1e5   : > { %995 = vst.msk [vmem:[%s2095_s24 + $0x70] sm:$0xff] %vm980_vm2, %v892_v52  ;;  %v1619_v53 = vpop.f32.mrb[14].mxu1 }
 0x1e6   : > { %v907_v54 = vadd.f32 %v1619_v53, %v2091_v20  ;;  %v901_v55 = vpop.f32.mrb[15].mxu1 }
 0x1e7   : > { %v902_v56 = vadd.f32 %v2091_v20, %v901_v55 }
 0x1e8   : > { %998 = vst.msk [vmem:[%s2095_s24 + $0x88] sm:$0xff] %vm980_vm2, %v907_v54 }
 0x1e9   : > { %997 = vst.msk [vmem:[%s2095_s24 + $0x80] sm:$0xff] %vm980_vm2, %v902_v56  ;;  %v1622_v57 = vpop.f32.mrb[16].mxu1 }
 0x1ea   : > { %v917_v58 = vadd.f32 %v1622_v57, %v2091_v20  ;;  %v911_v59 = vpop.f32.mrb[17].mxu1 }
 0x1eb   : > { %v912_v60 = vadd.f32 %v2091_v20, %v911_v59 }
 0x1ec   : > { %1000 = vst.msk [vmem:[%s2095_s24 + $0x98] sm:$0xff] %vm980_vm2, %v917_v58 }
 0x1ed   : > { %999 = vst.msk [vmem:[%s2095_s24 + $0x90] sm:$0xff] %vm980_vm2, %v912_v60  ;;  %v1625_v61 = vpop.f32.mrb[18].mxu1 }
 0x1ee   : > { %v927_v62 = vadd.f32 %v1625_v61, %v2091_v20  ;;  %v921_v63 = vpop.f32.mrb[19].mxu1 }
 0x1ef   : > { %v922_v0 = vadd.f32 %v2091_v20, %v921_v63 }
 0x1f0   : > { %1002 = vst.msk [vmem:[%s2095_s24 + $0xa8] sm:$0xff] %vm980_vm2, %v927_v62 }
 0x1f1   : > { %1001 = vst.msk [vmem:[%s2095_s24 + $0xa0] sm:$0xff] %vm980_vm2, %v922_v0  ;;  %v1628_v1 = vpop.f32.mrb[20].mxu1 }
 0x1f2   : > { %v937_v2 = vadd.f32 %v1628_v1, %v2091_v20  ;;  %v931_v3 = vpop.f32.mrb[21].mxu1 }
 0x1f3   : > { %v932_v4 = vadd.f32 %v2091_v20, %v931_v3 }
 0x1f4   : > { %1004 = vst.msk [vmem:[%s2095_s24 + $0xb8] sm:$0xff] %vm980_vm2, %v937_v2 }
 0x1f5   : > { %1003 = vst.msk [vmem:[%s2095_s24 + $0xb0] sm:$0xff] %vm980_vm2, %v932_v4  ;;  %v1631_v5 = vpop.f32.mrb[22].mxu1 }
 0x1f6   : > { %v947_v6 = vadd.f32 %v1631_v5, %v2091_v20  ;;  %v941_v7 = vpop.f32.mrb[23].mxu1 }
 0x1f7   : > { %v942_v8 = vadd.f32 %v2091_v20, %v941_v7 }
 0x1f8   : > { %1006 = vst.msk [vmem:[%s2095_s24 + $0xc8] sm:$0xff] %vm980_vm2, %v947_v6 }
 0x1f9   : > { %1005 = vst.msk [vmem:[%s2095_s24 + $0xc0] sm:$0xff] %vm980_vm2, %v942_v8  ;;  %v1634_v9 = vpop.f32.mrb[24].mxu1 }
 0x1fa   : > { %v957_v10 = vadd.f32 %v1634_v9, %v2091_v20  ;;  %v951_v11 = vpop.f32.mrb[25].mxu1 }
 0x1fb   : > { %v952_v12 = vadd.f32 %v2091_v20, %v951_v11 }
 0x1fc   : > { %1008 = vst.msk [vmem:[%s2095_s24 + $0xd8] sm:$0xff] %vm980_vm2, %v957_v10 }
 0x1fd   : > { %1007 = vst.msk [vmem:[%s2095_s24 + $0xd0] sm:$0xff] %vm980_vm2, %v952_v12  ;;  %v1637_v13 = vpop.f32.mrb[26].mxu1 }
 0x1fe   : > { %v967_v14 = vadd.f32 %v1637_v13, %v2091_v20  ;;  %v961_v15 = vpop.f32.mrb[27].mxu1 }
 0x1ff   : > { %v962_v16 = vadd.f32 %v2091_v20, %v961_v15  ;;  %1019 = sbr.rel (!%p1904_p4) target bundleno = 574 (0x23e), region = 44 }
 0x200   : > { %1010 = vst.msk [vmem:[%s2095_s24 + $0xe8] sm:$0xff] %vm980_vm2, %v967_v14 }
 0x201   : > { %1009 = vst.msk [vmem:[%s2095_s24 + $0xe0] sm:$0xff] %vm980_vm2, %v962_v16  ;;  %v1640_v17 = vpop.f32.mrb[28].mxu1 }
 0x202   : > { %v977_v18 = vadd.f32 %v1640_v17, %v2091_v20  ;;  %v971_v19 = vpop.f32.mrb[29].mxu1 }
 0x203   : > { %v972_v21 = vadd.f32 %v2091_v20, %v971_v19 }
 0x204   : > { %1012 = vst.msk [vmem:[%s2095_s24 + $0xf8] sm:$0xff] %vm980_vm2, %v977_v18 }
 0x205   : > { %1011 = vst.msk [vmem:[%s2095_s24 + $0xf0] sm:$0xff] %vm980_vm2, %v972_v21 }
 0x206   : > { %s2346_s18 = smov (!%p1022_p8, %s1021_s18), 32 }
 0x207   : > { %s1427_s6 = sshll.u32 %s2346_s18, 7 }
 0x208   : > { %p1430_p9 = scmp.eq.s32.totalorder %s1427_s6, 0 }
 0x209   : > { %s2204_s7 = sshrl.u32 (!%p1430_p9), %s2346_s18, 5 }
 0x20a   : > { %1030 = sbr.rel (%p1430_p9) target bundleno = 574 (0x23e), region = 48  ;;  %p1431_p10 = scmp.le.s32.totalorder (!%p1430_p9), %s2204_s7, 0 }
 0x211   : > { %1308 = sbr.rel (%p1431_p10) target bundleno = 553 (0x229), region = 124  ;;  %s2337_s21 = smov (!%p1431_p10), %s2198_s30 }
 0x212   : > { %s2338_s26 = smov (!%p1431_p10), %s2095_s24  ;;  %s2213_s8 = smov (!%p1431_p10), 0  }
 0x213   : > { %s2215_s9 = smov (!%p1431_p10), 0  }
 0x218 LB: >> { %v1154_v20 = vld [vmem:[%s1823_s26] sm:$0xff]  ;;  %v1156_v50 = vld [vmem:[%s1823_s26 + $0x8] sm:$0xff]  ;;  %v1158_v22 = vld [vmem:[%s1823_s26 + $0x10] sm:$0xff]  ;;  %s1218_s10 = sadd.s32 1, %s1827_s8  ;;  %s1148_s9 = sadd.s32 1, %s1831_s9   ;;  %s1831_s9 = sphi %s2215_s9, %s1148_s9   ;;  %s1827_s8 = sphi %s2213_s8, %s2341_s8   ;;  %s1823_s26 = sphi %s2338_s26, %s2340_s26   ;;  %s1819_s21 = sphi %s2337_s21, %s2339_s21  }
 0x219   : >> { %1155 = vst [vmem:[%s1819_s21] sm:$0xff] %v1154_v20  ;;  %1157 = vst [vmem:[%s1819_s21 + $0x8] sm:$0xff] %v1156_v50  ;;  %v1160_v23 = vld [vmem:[%s1823_s26 + $0x18] sm:$0xff]  ;;  %v1162_v24 = vld [vmem:[%s1823_s26 + $0x20] sm:$0xff]  ;;  %p1219_p11 = scmp.ge.s32.totalorder %s1218_s10, %s2204_s7  ;;  %p1147_p12 = scmp.ge.s32.totalorder %s1148_s9, %s2204_s7 }
 0x21a   : >> { %1159 = vst [vmem:[%s1819_s21 + $0x10] sm:$0xff] %v1158_v22  ;;  %v1164_v25 = vld [vmem:[%s1823_s26 + $0x28] sm:$0xff]  ;;  %1161 = vst [vmem:[%s1819_s21 + $0x18] sm:$0xff] %v1160_v23  ;;  %v1166_v26 = vld [vmem:[%s1823_s26 + $0x30] sm:$0xff] }
 0x21b   : >> { %1163 = vst [vmem:[%s1819_s21 + $0x20] sm:$0xff] %v1162_v24  ;;  %1165 = vst [vmem:[%s1819_s21 + $0x28] sm:$0xff] %v1164_v25  ;;  %v1168_v27 = vld [vmem:[%s1823_s26 + $0x38] sm:$0xff]  ;;  %v1170_v28 = vld [vmem:[%s1823_s26 + $0x40] sm:$0xff]  ;;  %s2348_s10 = smov (%p1219_p11, %s1218_s10), 0 }
 0x21c   : >> { %1167 = vst [vmem:[%s1819_s21 + $0x30] sm:$0xff] %v1166_v26  ;;  %1169 = vst [vmem:[%s1819_s21 + $0x38] sm:$0xff] %v1168_v27  ;;  %v1172_v29 = vld [vmem:[%s1823_s26 + $0x48] sm:$0xff]  ;;  %v1174_v30 = vld [vmem:[%s1823_s26 + $0x50] sm:$0xff]  ;;  %s1432_s11 = sshll.u32 %s2348_s10, 8  ;;  %s2341_s8 = smov %s2348_s10 }
 0x21d   : >> { %1171 = vst [vmem:[%s1819_s21 + $0x40] sm:$0xff] %v1170_v28  ;;  %v1176_v31 = vld [vmem:[%s1823_s26 + $0x58] sm:$0xff]  ;;  %1173 = vst [vmem:[%s1819_s21 + $0x48] sm:$0xff] %v1172_v29  ;;  %v1178_v32 = vld [vmem:[%s1823_s26 + $0x60] sm:$0xff]  ;;  %s2271_s12 = scalar_lea.vmem %s2095_s24, %s1432_s11 [#allocation2]   ;;  %s1224_s13 = scalar_lea.vmem %s2198_s30, %s1432_s11  }
 0x21e   : >> { %1175 = vst [vmem:[%s1819_s21 + $0x50] sm:$0xff] %v1174_v30  ;;  %1177 = vst [vmem:[%s1819_s21 + $0x58] sm:$0xff] %v1176_v31  ;;  %v1180_v33 = vld [vmem:[%s1823_s26 + $0x68] sm:$0xff]  ;;  %v1182_v34 = vld [vmem:[%s1823_s26 + $0x70] sm:$0xff] }
 0x21f   : >> { %1179 = vst [vmem:[%s1819_s21 + $0x60] sm:$0xff] %v1178_v32  ;;  %1181 = vst [vmem:[%s1819_s21 + $0x68] sm:$0xff] %v1180_v33  ;;  %v1184_v35 = vld [vmem:[%s1823_s26 + $0x78] sm:$0xff]  ;;  %v1186_v36 = vld [vmem:[%s1823_s26 + $0x80] sm:$0xff] }
 0x220   : >> { %1183 = vst [vmem:[%s1819_s21 + $0x70] sm:$0xff] %v1182_v34  ;;  %v1188_v37 = vld [vmem:[%s1823_s26 + $0x88] sm:$0xff]  ;;  %1185 = vst [vmem:[%s1819_s21 + $0x78] sm:$0xff] %v1184_v35  ;;  %v1190_v38 = vld [vmem:[%s1823_s26 + $0x90] sm:$0xff] }
 0x221   : >> { %1187 = vst [vmem:[%s1819_s21 + $0x80] sm:$0xff] %v1186_v36  ;;  %1189 = vst [vmem:[%s1819_s21 + $0x88] sm:$0xff] %v1188_v37  ;;  %v1192_v39 = vld [vmem:[%s1823_s26 + $0x98] sm:$0xff]  ;;  %v1194_v40 = vld [vmem:[%s1823_s26 + $0xa0] sm:$0xff] }
 0x222   : >> { %1191 = vst [vmem:[%s1819_s21 + $0x90] sm:$0xff] %v1190_v38  ;;  %1193 = vst [vmem:[%s1819_s21 + $0x98] sm:$0xff] %v1192_v39  ;;  %v1196_v41 = vld [vmem:[%s1823_s26 + $0xa8] sm:$0xff]  ;;  %v1198_v42 = vld [vmem:[%s1823_s26 + $0xb0] sm:$0xff]  ;;  %1150 = sbr.rel (!%p1147_p12) target bundleno = 536 (0x218), region = 130 }
 0x223   : >> { %1195 = vst [vmem:[%s1819_s21 + $0xa0] sm:$0xff] %v1194_v40  ;;  %v1200_v43 = vld [vmem:[%s1823_s26 + $0xb8] sm:$0xff]  ;;  %1197 = vst [vmem:[%s1819_s21 + $0xa8] sm:$0xff] %v1196_v41  ;;  %v1202_v44 = vld [vmem:[%s1823_s26 + $0xc0] sm:$0xff] }
 0x224   : >> { %1199 = vst [vmem:[%s1819_s21 + $0xb0] sm:$0xff] %v1198_v42  ;;  %1201 = vst [vmem:[%s1819_s21 + $0xb8] sm:$0xff] %v1200_v43  ;;  %v1204_v45 = vld [vmem:[%s1823_s26 + $0xc8] sm:$0xff]  ;;  %v1206_v46 = vld [vmem:[%s1823_s26 + $0xd0] sm:$0xff] }
 0x225   : >> { %1203 = vst [vmem:[%s1819_s21 + $0xc0] sm:$0xff] %v1202_v44  ;;  %1205 = vst [vmem:[%s1819_s21 + $0xc8] sm:$0xff] %v1204_v45  ;;  %v1208_v47 = vld [vmem:[%s1823_s26 + $0xd8] sm:$0xff]  ;;  %v1210_v48 = vld [vmem:[%s1823_s26 + $0xe0] sm:$0xff] }
 0x226   : >> { %1207 = vst [vmem:[%s1819_s21 + $0xd0] sm:$0xff] %v1206_v46  ;;  %v1212_v49 = vld [vmem:[%s1823_s26 + $0xe8] sm:$0xff]  ;;  %1209 = vst [vmem:[%s1819_s21 + $0xd8] sm:$0xff] %v1208_v47  ;;  %v1214_v51 = vld [vmem:[%s1823_s26 + $0xf0] sm:$0xff] }
 0x227   : >> { %1211 = vst [vmem:[%s1819_s21 + $0xe0] sm:$0xff] %v1210_v48  ;;  %1213 = vst [vmem:[%s1819_s21 + $0xe8] sm:$0xff] %v1212_v49  ;;  %v1216_v52 = vld [vmem:[%s1823_s26 + $0xf8] sm:$0xff]  ;;  %s2340_s26 = smov %s2271_s12 }
 0x228   : >> { %1215 = vst [vmem:[%s1819_s21 + $0xf0] sm:$0xff] %v1214_v51  ;;  %1217 = vst [vmem:[%s1819_s21 + $0xf8] sm:$0xff] %v1216_v52  ;;  %s2339_s21 = smov %s1224_s13 }
 0x229 PF: > { %s2312_s14 = sand.u32 31, %s2346_s18   ;;  %s1443_s15 = sshll.u32 %s2204_s7, 8 }
 0x22a   : > { %s1229_s16 = scalar_lea.vmem %s2095_s24, %s1443_s15 [#allocation2]   ;;  %s1231_s17 = scalar_lea.vmem %s2198_s30, %s1443_s15  }
 0x22b   : > { %p1437_p13 = scmp.le.s32.totalorder %s2312_s14, 0 }
 0x22c   : > { %s1833_s20 = smov (!%p1437_p13), %s1231_s17   ;;  %s1837_s23 = smov (!%p1437_p13), %s1229_s16  }
 0x22d   : > { %1322 = sbr.rel (%p1437_p13) target bundleno = 574 (0x23e), region = 135  ;;  %s1841_s27 = smov (!%p1437_p13), 0  }
 0x22e   : > { %s1845_s28 = smov (!%p1437_p13), 0  }
 0x234 LB: >> { %v1241_v53 = vld [vmem:[%s1839_s23] sm:$0xff]  ;;  %s1243_s18 = sadd.s32 1, %s1843_s27  ;;  %s1235_s28 = sadd.s32 1, %s1847_s28   ;;  %s1847_s28 = sphi %s1845_s28, %s1235_s28   ;;  %s1843_s27 = sphi %s1841_s27, %s1842_s27   ;;  %s1839_s23 = sphi %s1837_s23, %s1248_s23   ;;  %s1835_s20 = sphi %s1833_s20, %s1249_s20  }
 0x235   : >> { %1242 = vst [vmem:[%s1835_s20] sm:$0xff] %v1241_v53  ;;  %p1244_p0 = scmp.ge.s32.totalorder %s1243_s18, %s2312_s14  ;;  %p1234_p1 = scmp.ge.s32.totalorder %s1235_s28, %s2312_s14 }
 0x237   : >> { %s2350_s18 = smov (%p1244_p0, %s1243_s18), 0  ;;  %1237 = sbr.rel (!%p1234_p1) target bundleno = 564 (0x234), region = 141 }
 0x238   : >> { %s1438_s24 = sshll.u32 %s2350_s18, 3  ;;  %s1842_s27 = smov %s2350_s18  }
 0x239   : >> { %s1248_s23 = scalar_lea.vmem %s1229_s16, %s1438_s24 [#allocation2]   ;;  %s1249_s20 = scalar_lea.vmem %s1231_s17, %s1438_s24  }
 0x23e PF: > { %p12_p2 = scmp.ge.s32.totalorder %s1894_s22, 6   ;;  %s2342_s18 = smov %s1811_s19 }
 0x23f   : > { %s2343_s19 = smov %s1902_s25  ;;  %s2344_s20 = smov %s1894_s22 }
 0x240   :  { %14 = sbr.rel (!%p12_p2) target bundleno = 2 (0x2), region = 152 }

</bundles_post_ra>
